<compile_context>
chip_gen: v7x
topology: tpu7x:2x2x1
jax: 0.10.0
libtpu: 0.0.40
codegen_flags: <defaults>
</compile_context>

<pallas_src>
import functools

import jax
import jax.numpy as jnp
from jax import lax
from jax.experimental import pallas as pl
from jax.experimental.pallas import tpu as pltpu


def _vmem_limit_bytes():
    """Generation-aware scoped-VMEM budget: ~85% of physical VMEM, capped at 110 MiB
    (=> ~54 MiB on v7x's 64 MiB/TC, ~108 MiB on v5e/v6e's 128 MiB)."""
    try:
        info = pltpu.get_tpu_info()
        cap = getattr(info, "vmem_capacity_bytes", None)
        if cap:
            return int(min(cap * 0.85, 110 * 1024 * 1024))
    except Exception:
        pass
    return 48 * 1024 * 1024


VMEM_LIMIT = _vmem_limit_bytes()


def _pick_tile(dim, tile, align=1):
    """Largest divisor of `dim` that is <= tile and a multiple of `align`
    (falls back to the full dim, which always satisfies the (8,128) rule)."""
    t = min(tile, dim)
    if t >= dim:
        return dim
    t -= t % align
    while t >= align:
        if dim % t == 0:
            return t
        t -= align
    return dim


# ----------------------- tiled matmul with fused epilogue -----------------------

def _fused_matmul_kernel(*refs, act, has_res, has_ln, eps, single_k):
    it = iter(refs)
    x_ref = next(it)
    w_ref = next(it)
    b_ref = next(it)
    res_ref = next(it) if has_res else None
    if has_ln:
        g_ref = next(it)
        beta_ref = next(it)
    o_ref = next(it)
    acc_ref = None if single_k else next(it)

    def epilogue(acc):
        y = acc + b_ref[...]
        if act == "gelu":
            # exact (erf) GELU for parity with torch/BERT intermediate activation.
            y = jax.nn.gelu(y, approximate=False)
        if has_res:
            y = y + res_ref[...].astype(jnp.float32)
        if has_ln:
            mu = jnp.mean(y, axis=-1, keepdims=True)
            var = jnp.mean(jnp.square(y - mu), axis=-1, keepdims=True)
            y = (y - mu) * lax.rsqrt(var + eps) * g_ref[...] + beta_ref[...]
        o_ref[...] = y.astype(o_ref.dtype)

    x = x_ref[...]
    if x.dtype != jnp.bfloat16:          # inputs are already bf16 in steady state
        x = x.astype(jnp.bfloat16)
    partial = jnp.dot(x, w_ref[...], preferred_element_type=jnp.float32)

    if single_k:
        epilogue(partial)
    else:
        k = pl.program_id(2)

        @pl.when(k == 0)
        def _():
            acc_ref[...] = jnp.zeros_like(acc_ref)

        acc_ref[...] += partial

        @pl.when(k == pl.num_programs(2) - 1)
        def _():
            epilogue(acc_ref[...])


def fused_linear(x, w, b, *, act=None, residual=None, ln=None, eps=1e-12,
                 tm=512, tn=768, tk=1024, out_dtype=jnp.bfloat16):
    """x:(M,K) @ w:(K,N) + b, optional fused GELU / residual add / LayerNorm epilogue.
    bf16 MXU inputs, f32 accumulation, bf16 output."""
    M, K = x.shape
    N = w.shape[1]
    if ln is not None:
        tn = N                      # LayerNorm epilogue needs complete rows
    tm = _pick_tile(M, tm, 8)
    tn = _pick_tile(N, tn, 128)
    tk = _pick_tile(K, tk, 128)
    grid = (M // tm, N // tn, K // tk)
    single_k = grid[2] == 1

    in_specs = [
        pl.BlockSpec((tm, tk), lambda i, j, k: (i, k)),
        pl.BlockSpec((tk, tn), lambda i, j, k: (k, j)),
        pl.BlockSpec((1, tn), lambda i, j, k: (0, j)),
    ]
    inputs = [x, w, b.reshape(1, N)]
    has_res = residual is not None
    has_ln = ln is not None
    if has_res:
        in_specs.append(pl.BlockSpec((tm, tn), lambda i, j, k: (i, j)))
        inputs.append(residual)
    if has_ln:
        g, beta = ln
        in_specs.append(pl.BlockSpec((1, tn), lambda i, j, k: (0, j)))
        in_specs.append(pl.BlockSpec((1, tn), lambda i, j, k: (0, j)))
        inputs.extend([g.reshape(1, N), beta.reshape(1, N)])

    out_itemsize = jnp.dtype(out_dtype).itemsize
    bytes_accessed = (M * K * x.dtype.itemsize + K * N * w.dtype.itemsize
                      + M * N * out_itemsize
                      + (M * N * residual.dtype.itemsize if has_res else 0))
    cost = pl.CostEstimate(
        flops=int(2 * M * N * K),
        transcendentals=int(M * N) if act == "gelu" else 0,
        bytes_accessed=int(bytes_accessed),
    )

    scratch = [] if single_k else [pltpu.VMEM((tm, tn), jnp.float32)]

    return pl.pallas_call(
        functools.partial(_fused_matmul_kernel, act=act, has_res=has_res,
                          has_ln=has_ln, eps=eps, single_k=single_k),
        out_shape=jax.ShapeDtypeStruct((M, N), out_dtype),
        grid=grid,
        in_specs=in_specs,
        out_specs=pl.BlockSpec((tm, tn), lambda i, j, k: (i, j)),
        scratch_shapes=scratch,
        compiler_params=pltpu.CompilerParams(
            dimension_semantics=("parallel", "parallel", "arbitrary"),
            vmem_limit_bytes=VMEM_LIMIT),
        cost_estimate=cost,
    )(*inputs)


# ----------------------------------- attention ----------------------------------

def _attention_kernel(qkv_ref, m_ref, o_ref, *, heads, head_dim, scale, tq):
    # qkv_ref: (1, S, 3D) bf16 block, resident across the q-tile axis.
    # m_ref:   (1, 1, S) additive padding-mask bias (f32).
    # o_ref:   (1, tq, D) bf16 output tile for this (batch, q-tile).
    D = heads * head_dim
    q0 = pl.multiple_of(pl.program_id(1) * tq, tq)
    bias = m_ref[0]                                   # (1, S) f32
    outs = []
    # TODO(synk): with head_dim=64, odd-head lane slices straddle the 128-lane
    # vreg; a head-pair packed w_qkv layout would remove the masked extracts.
    for h in range(heads):                            # static head slices
        lo = h * head_dim
        qh = qkv_ref[0, pl.ds(q0, tq), lo:lo + head_dim]            # (tq, Dh) bf16
        kh = qkv_ref[0, :, D + lo:D + lo + head_dim]                # (S, Dh)  bf16
        vh = qkv_ref[0, :, 2 * D + lo:2 * D + lo + head_dim]        # (S, Dh)  bf16
        # q @ k^T without an explicit transpose (NT contraction on the MXU).
        s = lax.dot_general(qh, kh, (((1,), (1,)), ((), ())),
                            preferred_element_type=jnp.float32)     # (tq, S) f32
        s = s * scale + bias
        s = s - jnp.max(s, axis=-1, keepdims=True)
        p = jnp.exp(s)
        p = p * pl.reciprocal(jnp.sum(p, axis=-1, keepdims=True), approx=True)
        outs.append(jnp.dot(p.astype(jnp.bfloat16), vh,
                            preferred_element_type=jnp.float32))
    ctx = outs[0] if heads == 1 else jnp.concatenate(outs, axis=-1)
    o_ref[0] = ctx.astype(o_ref.dtype)                # single lane-dense store


def attention(qkv, mask_bias, heads, head_dim, tq=256):
    """qkv: (B, S, 3D) fused projections (bf16); mask_bias: (B, 1, S) -> (B, S, D) bf16."""
    B, S, threeD = qkv.shape
    D = heads * head_dim
    scale = 1.0 / (head_dim ** 0.5)
    tq = _pick_tile(S, tq, 8)
    cost = pl.CostEstimate(
        flops=int(4 * B * heads * S * S * head_dim),
        transcendentals=int(B * heads * S * S),
        bytes_accessed=int(B * S * threeD * qkv.dtype.itemsize
                           + B * S * D * 2 + B * S * 4),
    )
    return pl.pallas_call(
        functools.partial(_attention_kernel, heads=heads, head_dim=head_dim,
                          scale=scale, tq=tq),
        out_shape=jax.ShapeDtypeStruct((B, S, D), jnp.bfloat16),
        grid=(B, S // tq),
        in_specs=[
            pl.BlockSpec((1, S, threeD), lambda b, qi: (b, 0, 0)),
            pl.BlockSpec((1, 1, S), lambda b, qi: (b, 0, 0)),
        ],
        out_specs=pl.BlockSpec((1, tq, D), lambda b, qi: (b, qi, 0)),
        compiler_params=pltpu.CompilerParams(
            dimension_semantics=("parallel", "parallel"),
            vmem_limit_bytes=VMEM_LIMIT),
        cost_estimate=cost,
    )(qkv, mask_bias)


# ----------------------------- standalone layernorm -----------------------------
# Only used once, for the embedding LN (all other LNs are fused into matmul epilogues).

def _layernorm_kernel(x_ref, g_ref, b_ref, o_ref, *, eps):
    x = x_ref[...].astype(jnp.float32)
    mu = jnp.mean(x, axis=-1, keepdims=True)
    var = jnp.mean(jnp.square(x - mu), axis=-1, keepdims=True)
    y = (x - mu) * lax.rsqrt(var + eps) * g_ref[...] + b_ref[...]
    o_ref[...] = y.astype(o_ref.dtype)


def layernorm(x, g, b, eps=1e-12, tm=512):
    M, D = x.shape
    tm = _pick_tile(M, tm, 8)
    return pl.pallas_call(
        functools.partial(_layernorm_kernel, eps=eps),
        out_shape=jax.ShapeDtypeStruct((M, D), jnp.bfloat16),
        grid=(M // tm,),
        in_specs=[
            pl.BlockSpec((tm, D), lambda i: (i, 0)),
            pl.BlockSpec((1, D), lambda i: (0, 0)),
            pl.BlockSpec((1, D), lambda i: (0, 0)),
        ],
        out_specs=pl.BlockSpec((tm, D), lambda i: (i, 0)),
        compiler_params=pltpu.CompilerParams(
            dimension_semantics=("parallel",),
            vmem_limit_bytes=VMEM_LIMIT),
    )(x, g.reshape(1, D), b.reshape(1, D))


# -------------------------- pooler + feedforward + sigmoid ------------------------
# 2-D grid (B-tiles x S-tiles): the sequence axis is streamed through a (tb, D)
# f32 VMEM accumulator, so the block footprint is (tb, ts, D) instead of the
# whole (tb, S, D) slab (which cannot fit VMEM at realistic shapes).

def _pool_ff_sigmoid_kernel(h_ref, w_ref, b_ref, o_ref, acc_ref, *, inv_seq, n_is_one):
    s = pl.program_id(1)

    @pl.when(s == 0)
    def _():
        acc_ref[...] = jnp.zeros_like(acc_ref)

    acc_ref[...] += jnp.sum(h_ref[...].astype(jnp.float32), axis=1)

    @pl.when(s == pl.num_programs(1) - 1)
    def _():
        # MeanPooling over the sequence axis (matches torch.mean(dim=1): mask-agnostic).
        pooled = acc_ref[...] * inv_seq                                  # (tb, D)
        if n_is_one:
            # D->1 head as a VPU reduction: avoids an MXU issue + lane-1 matmul.
            logits = jnp.sum(pooled * w_ref[...], axis=-1, keepdims=True)
        else:
            logits = jnp.dot(pooled, w_ref[...], preferred_element_type=jnp.float32)
        o_ref[...] = jax.nn.sigmoid(logits + b_ref[...])


def pool_ff_sigmoid(h, w, b, tb=128, ts=512):
    """h: (B, S, D) bf16; w: (D, N); b: (N,) -> sigmoid(mean_S(h) @ w + b) of shape (B, N)."""
    B, S, D = h.shape
    N = w.shape[1]
    tb = _pick_tile(B, tb, 8)
    ts = _pick_tile(S, ts, 8)
    n_is_one = (N == 1)
    w_in = w.reshape(1, D) if n_is_one else w
    w_spec = (pl.BlockSpec((1, D), lambda i, s: (0, 0)) if n_is_one
              else pl.BlockSpec((D, N), lambda i, s: (0, 0)))
    return pl.pallas_call(
        functools.partial(_pool_ff_sigmoid_kernel, inv_seq=1.0 / S, n_is_one=n_is_one),
        out_shape=jax.ShapeDtypeStruct((B, N), jnp.float32),
        grid=(B // tb, S // ts),
        in_specs=[
            pl.BlockSpec((tb, ts, D), lambda i, s: (i, s, 0)),
            w_spec,
            pl.BlockSpec((1, N), lambda i, s: (0, 0)),
        ],
        out_specs=pl.BlockSpec((tb, N), lambda i, s: (i, 0)),
        scratch_shapes=[pltpu.VMEM((tb, D), jnp.float32)],
        compiler_params=pltpu.CompilerParams(
            dimension_semantics=("parallel", "arbitrary"),
            vmem_limit_bytes=VMEM_LIMIT),
    )(h, w_in, b.reshape(1, N))


# ------------------------ parameters (synthetic init) ------------------------
# TODO(synk): original module loads BertModel.from_pretrained + torch.load'ed
# feedforward / ff_activation / pooler from disk; here weights are synthesized
# deterministically (Linear(D,1) + Sigmoid head, MeanPooling pooler).

def init_params(key, vocab, max_pos, D, H, L, I):
    ks = jax.random.split(key, 4 + L)

    def w(k, shape):
        return (0.02 * jax.random.normal(k, shape)).astype(jnp.float32)

    params = {
        "config": {"hidden": D, "heads": H, "layers": L},
        "word_emb": w(ks[0], (vocab, D)),
        "pos_emb": w(ks[1], (max_pos, D)),
        "type_emb": w(ks[2], (2, D)),
        "emb_ln_g": jnp.ones((D,), jnp.float32),
        "emb_ln_b": jnp.zeros((D,), jnp.float32),
        "ff_w": w(ks[3], (D, 1)),
        "ff_b": jnp.zeros((1,), jnp.float32),
        "layers": [],
    }
    for li in range(L):
        lk = jax.random.split(ks[4 + li], 6)
        wq, wk_, wv = w(lk[0], (D, D)), w(lk[1], (D, D)), w(lk[2], (D, D))
        params["layers"].append({
            # fused QKV projection, stored bf16 for the MXU input path
            "w_qkv": jnp.concatenate([wq, wk_, wv], axis=1).astype(jnp.bfloat16),
            "b_qkv": jnp.zeros((3 * D,), jnp.float32),
            "wo": w(lk[3], (D, D)).astype(jnp.bfloat16),
            "bo": jnp.zeros((D,), jnp.float32),
            "ln1_g": jnp.ones((D,), jnp.float32), "ln1_b": jnp.zeros((D,), jnp.float32),
            "w1": w(lk[4], (D, I)).astype(jnp.bfloat16), "b1": jnp.zeros((I,), jnp.float32),
            "w2": w(lk[5], (I, D)).astype(jnp.bfloat16), "b2": jnp.zeros((D,), jnp.float32),
            "ln2_g": jnp.ones((D,), jnp.float32), "ln2_b": jnp.zeros((D,), jnp.float32),
        })
    return params


# ------------------------------- forward pass --------------------------------

def scoring_model_forward(params, input_ids, attention_mask, token_type_ids):
    cfg = params["config"]
    D, H = cfg["hidden"], cfg["heads"]
    Dh = D // H
    B, S = input_ids.shape

    # BERT embeddings: gathers are XLA glue; layernorm runs in Pallas (bf16 out).
    h = (params["word_emb"][input_ids]
         + params["pos_emb"][:S][None, :, :]
         + params["type_emb"][token_type_ids])
    h = layernorm(h.reshape(B * S, D), params["emb_ln_g"], params["emb_ln_b"])

    # Additive attention-mask bias, one copy per batch (no per-head repeat).
    mask_bias = ((1.0 - attention_mask.astype(jnp.float32)) * -1e9).reshape(B, 1, S)

    for lp in params["layers"]:
        # fused QKV projection: one tiled matmul, (B*S, D) bf16 read once.
        qkv = fused_linear(h, lp["w_qkv"], lp["b_qkv"])                 # (B*S, 3D) bf16
        ctx = attention(qkv.reshape(B, S, 3 * D), mask_bias, H, Dh)     # (B, S, D)  bf16
        # wo-projection with fused bias + residual + post-LN epilogue (BERT post-LN).
        h1 = fused_linear(ctx.reshape(B * S, D), lp["wo"], lp["bo"],
                          residual=h, ln=(lp["ln1_g"], lp["ln1_b"]))
        inter = fused_linear(h1, lp["w1"], lp["b1"], act="gelu")
        # FFN-down projection with fused bias + residual + post-LN epilogue.
        h = fused_linear(inter, lp["w2"], lp["b2"],
                         residual=h1, ln=(lp["ln2_g"], lp["ln2_b"]))

    # pooler (MeanPooling over seq) + feedforward (D->1) + sigmoid, one fused kernel.
    return pool_ff_sigmoid(h.reshape(B, S, D), params["ff_w"], params["ff_b"])


# ----------------------------------- main ------------------------------------

if __name__ == "__main__":
    key = jax.random.PRNGKey(0)
    vocab, max_pos = 100, 64
    B, S, D, H, L, I = 2, 8, 32, 2, 2, 64

    pkey, ikey = jax.random.split(key)
    params = init_params(pkey, vocab, max_pos, D, H, L, I)

    input_ids = jax.random.randint(ikey, (B, S), 0, vocab, dtype=jnp.int32)
    attention_mask = jnp.ones((B, S), dtype=jnp.int32)
    token_type_ids = jnp.zeros((B, S), dtype=jnp.int32)

    out = scoring_model_forward(params, input_ids, attention_mask, token_type_ids)
    out = jax.block_until_ready(out)
    assert out.shape == (B, 1) and out.dtype == jnp.float32
    print("KERNEL_OK")
</pallas_src>

<mosaic_0001>
module attributes {stable_mosaic.version = 11 : i64} {
  func.func @_layernorm_kernel(%arg0: i32, %arg1: memref<16x32xf32, #tpu.memory_space<vmem>>, %arg2: memref<1x32xf32, #tpu.memory_space<vmem>>, %arg3: memref<1x32xf32, #tpu.memory_space<vmem>>, %arg4: memref<16x32xbf16, #tpu.memory_space<vmem>>) attributes {dimension_semantics = [#tpu.dimension_semantics<parallel>], iteration_bounds = array<i64: 1>, scalar_prefetch = 0 : i64, scratch_operands = 0 : i64, tpu.core_type = #tpu.core_type<tc>, window_params = [{transform_indices = @transform_0, window_bounds = array<i64: 16, 32>}, {pipeline_mode = #tpu.pipeline_mode<synchronous>, transform_indices = @transform_1, window_bounds = array<i64: 1, 32>}, {pipeline_mode = #tpu.pipeline_mode<synchronous>, transform_indices = @transform_2, window_bounds = array<i64: 1, 32>}, {transform_indices = @transform_3, window_bounds = array<i64: 16, 32>}]} {
    %c0 = arith.constant 0 : index
    %c0_0 = arith.constant 0 : index
    %0 = vector.load %arg1[%c0, %c0_0] : memref<16x32xf32, #tpu.memory_space<vmem>>, vector<16x32xf32>
    %cst = arith.constant dense<0.000000e+00> : vector<16xf32>
    %1 = vector.multi_reduction <add>, %0, %cst [1] : vector<16x32xf32> to vector<16xf32>
    %2 = vector.shape_cast %1 : vector<16xf32> to vector<16x1xf32>
    %cst_1 = arith.constant 3.200000e+01 : f32
    %3 = vector.broadcast %cst_1 : f32 to vector<16x1xf32>
    %4 = arith.divf %2, %3 : vector<16x1xf32>
    %5 = vector.broadcast %4 : vector<16x1xf32> to vector<16x32xf32>
    %6 = arith.subf %0, %5 : vector<16x32xf32>
    %7 = arith.mulf %6, %6 : vector<16x32xf32>
    %cst_2 = arith.constant dense<0.000000e+00> : vector<16xf32>
    %8 = vector.multi_reduction <add>, %7, %cst_2 [1] : vector<16x32xf32> to vector<16xf32>
    %9 = vector.shape_cast %8 : vector<16xf32> to vector<16x1xf32>
    %cst_3 = arith.constant 3.200000e+01 : f32
    %10 = vector.broadcast %cst_3 : f32 to vector<16x1xf32>
    %11 = arith.divf %9, %10 : vector<16x1xf32>
    %12 = vector.broadcast %4 : vector<16x1xf32> to vector<16x32xf32>
    %13 = arith.subf %0, %12 : vector<16x32xf32>
    %cst_4 = arith.constant 9.99999996E-13 : f32
    %14 = vector.broadcast %cst_4 : f32 to vector<16x1xf32>
    %15 = arith.addf %11, %14 : vector<16x1xf32>
    %16 = math.rsqrt %15 : vector<16x1xf32>
    %17 = vector.broadcast %16 : vector<16x1xf32> to vector<16x32xf32>
    %18 = arith.mulf %13, %17 : vector<16x32xf32>
    %c0_5 = arith.constant 0 : index
    %c0_6 = arith.constant 0 : index
    %19 = vector.load %arg2[%c0_5, %c0_6] : memref<1x32xf32, #tpu.memory_space<vmem>>, vector<1x32xf32>
    %20 = vector.broadcast %19 : vector<1x32xf32> to vector<16x32xf32>
    %21 = arith.mulf %18, %20 : vector<16x32xf32>
    %c0_7 = arith.constant 0 : index
    %c0_8 = arith.constant 0 : index
    %22 = vector.load %arg3[%c0_7, %c0_8] : memref<1x32xf32, #tpu.memory_space<vmem>>, vector<1x32xf32>
    %23 = vector.broadcast %22 : vector<1x32xf32> to vector<16x32xf32>
    %24 = arith.addf %21, %23 : vector<16x32xf32>
    %25 = arith.truncf %24 : vector<16x32xf32> to vector<16x32xbf16>
    %c0_9 = arith.constant 0 : index
    %c0_10 = arith.constant 0 : index
    %26 = vector.load %arg4[%c0_9, %c0_10] : memref<16x32xbf16, #tpu.memory_space<vmem>>, vector<16x32xbf16>
    tpu.vector_store %arg4[%c0_9, %c0_10], %25 {strides = array<i32>} : memref<16x32xbf16, #tpu.memory_space<vmem>>, vector<16x32xbf16>,
    return
  }
  func.func @transform_0(%arg0: i32) -> (i32, i32) {
    %c0_i32 = arith.constant 0 : i32
    %c0_i32_0 = arith.constant 0 : i32
    return %arg0, %c0_i32 : i32, i32
  }
  func.func @transform_1(%arg0: i32) -> (i32, i32) {
    %c0_i32 = arith.constant 0 : i32
    %c0_i32_0 = arith.constant 0 : i32
    %c0_i32_1 = arith.constant 0 : i32
    return %c0_i32, %c0_i32_0 : i32, i32
  }
  func.func @transform_2(%arg0: i32) -> (i32, i32) {
    %c0_i32 = arith.constant 0 : i32
    %c0_i32_0 = arith.constant 0 : i32
    %c0_i32_1 = arith.constant 0 : i32
    return %c0_i32, %c0_i32_0 : i32, i32
  }
  func.func @transform_3(%arg0: i32) -> (i32, i32) {
    %c0_i32 = arith.constant 0 : i32
    %c0_i32_0 = arith.constant 0 : i32
    return %arg0, %c0_i32 : i32, i32
  }
}

</mosaic_0001>

<bundles_post_ra>
// kernel: tpu_custom_call.1
= control target key start
LH: loop header
LB: loop body
LE: loop exit
PB: predicated region body
PF: predicated region fallthrough
CT: control target
= control target key end

     0   :  { %8 = vsyncpa [#allocation3], 0  ;;  %s229_s0 = inlined_call_operand.hbm [shape: f32[16,32], index: 0, kind: input, shape index: {}]   ;;  %s230_s1 = inlined_call_operand.vmem [shape: f32[1,32], index: 1, kind: input, shape index: {}]   ;;  %s231_s2 = inlined_call_operand.vmem [shape: f32[1,32], index: 2, kind: input, shape index: {}]   ;;  %s232_s3 = inlined_call_operand.hbm [shape: bf16[16,32], index: 3, kind: output, shape index: {}]  }
   0x1   :  { %9 = vsyncpa [#allocation4], 0  ;;  %s169_s12 = smov [#allocation2]   ;;  %s121_s16 = scalar_lea.hbm %s229_s0, 256 }
   0x2   :  { %s15_s13 = sshll.u32 %s169_s12, 4  ;;  %p122_p0 = scmp.ne.s32.totalorder %s229_s0, %s121_s16  ;;  %s16_s13 = int_to_ptr.vmem [resolvable:$true] %s15_s13 }
   0x3   :  { %p125_p1 = scmp.lt.u32.totalorder %s121_s16, %s229_s0 }
   0x5   :  { %p127_p2 = pnand %p125_p1, %p122_p0 }
   0x7   :  { %130 = shalt.err (!%p127_p2)
}
   0x8   :  { %s131_s21 = scalar_lea.vmem %s16_s13, 256  ;;  %p136_p4 = scmp.lt.s32.totalorder %s16_s13, %s16_s13 }
   0x9   :  { %p132_p3 = scmp.ne.s32.totalorder %s16_s13, %s131_s21  ;;  %p137_p5 = scmp.lt.s32.totalorder %s131_s21, %s131_s21 }
   0xb   :  { %p138_p6 = por %p137_p5, %p136_p4 }
   0xd   :  { %p139_p7 = pnand %p138_p6, %p132_p3 }
   0xf   :  { %142 = shalt.err (!%p139_p7)
}
  0x10   :  { %s170_s22 = smov 128   ;;  %s171_s23 = smov 8  }
  0x11   :  { %21 = dma.hbm_to_vmem [thread:$0]  %s229_s0, 256, %s16_s13, [#allocation3], %s170_s22, %s170_s22, %s171_s23  }
  0x12   :  { %165 = dma.done.wait [#allocation3], 256  }
  0x13   :  { %166 = vsyncadd [#allocation3], 4294967040  ;;  %vm31_vm0 = vcmask 261120   ;;  %v29_v0 = vld [vmem:[#allocation2] sm:$0xff]  ;;  %v30_v1 = vld [vmem:[#allocation2 + $0x8] sm:$0xff]  ;;  %vm85_vm1 = vcmask 257024  }
  0x14   :  { %v32_v2 = vsel %vm31_vm0, %v29_v0, 0.0  ;;  %v35_v3 = vsel %vm31_vm0, %v30_v1, 0.0  ;;  %v105_v21 = vld [vmem:[%s230_s1] ss:$0 sm:$0xff]  ;;  %s172_s29 = smov [#allocation5]  }
  0x15   :  { %33 = vadd.xlane.f32.xlu0 %v32_v2  ;;  %v106_v23 = vld [vmem:[%s231_s2] ss:$0 sm:$0xff]  ;;  %s93_s30 = sshll.u32 %s172_s29, 4  ;;  %s94_s30 = int_to_ptr.vmem [resolvable:$true] %s93_s30 }
  0x16   :  { %s143_s1 = scalar_lea.vmem %s94_s30, 128  ;;  %p148_p9 = scmp.lt.s32.totalorder %s94_s30, %s94_s30 }
  0x17   :  { %p144_p8 = scmp.ne.s32.totalorder %s94_s30, %s143_s1  ;;  %p149_p10 = scmp.lt.s32.totalorder %s143_s1, %s143_s1 }
  0x19   :  { %36 = vadd.xlane.f32.xlu0 %v35_v3  ;;  %p150_p11 = por %p149_p10, %p148_p9 }
  0x1b   :  { %p151_p12 = pnand %p150_p11, %p144_p8 }
  0xa2   :  { %v34_v4 = vpop.xlane.xlu0 %33 }
  0xa3   :  { %v39_v5 = vmul.f32 0.03125, %v34_v4 }
  0xa5   :  { %v41_v6 = vsub.f32 %v29_v0, %v39_v5 }
  0xa6   :  { %v37_v7 = vpop.xlane.xlu0 %36 }
  0xa7   :  { %v40_v8 = vmul.f32 0.03125, %v37_v7  ;;  %v43_v9 = vmul.f32 %v41_v6, %v41_v6 }
  0xa9   :  { %v42_v10 = vsub.f32 %v30_v1, %v40_v8  ;;  %v45_v11 = vsel %vm31_vm0, %v43_v9, 0.0 }
  0xaa   :  { %46 = vadd.xlane.f32.xlu1 %v45_v11 }
  0xab   :  { %v44_v12 = vmul.f32 %v42_v10, %v42_v10 }
  0xad   :  { %v48_v13 = vsel %vm31_vm0, %v44_v12, 0.0 }
  0xae   :  { %49 = vadd.xlane.f32.xlu1 %v48_v13 }
 0x137   :  { %v47_v14 = vpop.xlane.xlu1 %46 }
 0x138   :  { %v51_v15 = vmul.f32 0.03125, %v47_v14 }
 0x13a   :  { %v53_v16 = vadd.f32 1e-12, %v51_v15 }
 0x13b   :  { %v50_v17 = vpop.xlane.xlu1 %49 }
 0x13c   :  { %117 = vrsqrt.f32 %v53_v16  ;;  %v52_v18 = vmul.f32 0.03125, %v50_v17 }
 0x13e   :  { %v54_v19 = vadd.f32 1e-12, %v52_v18 }
 0x140   :  { %119 = vrsqrt.f32 %v54_v19 }
 0x146   :  { %v118_v20 = vpop.eup %117 }
 0x147   :  { %v57_v22 = vmul.f32 %v118_v20, %v41_v6 }
 0x149   :  { %v66_v24 = vmul.f32 %v105_v21, %v57_v22 }
 0x14a   :  { %v120_v25 = vpop.eup %119 }
 0x14b   :  { %v58_v26 = vmul.f32 %v120_v25, %v42_v10  ;;  %v75_v27 = vadd.f32 %v106_v23, %v66_v24 }
 0x14d   :  { %v67_v28 = vmul.f32 %v105_v21, %v58_v26  ;;  %v109_v29 = vpack.c.bf16 %v75_v27, %v75_v27 }
 0x14f   :  { %v76_v30 = vadd.f32 %v106_v23, %v67_v28  ;;  %86 = vst.msk [vmem:[#allocation5] sm:$0xf] %vm85_vm1, %v109_v29 }
 0x151   :  { %v110_v31 = vpack.c.bf16 %v76_v30, %v76_v30 }
 0x153   :  { %87 = vst.msk [vmem:[#allocation5 + $0x4] sm:$0xf] %vm85_vm1, %v110_v31 }
 0x154   :  { %154 = shalt.err (!%p151_p12)
}
 0x155   :  { %s155_s5 = scalar_lea.hbm %s232_s3, 128 }
 0x156   :  { %p156_p13 = scmp.ne.s32.totalorder %s232_s3, %s155_s5  ;;  %p159_p0 = scmp.lt.u32.totalorder %s155_s5, %s232_s3 }
 0x158   :  { %p161_p1 = pnand %p159_p0, %p156_p13 }
 0x15a   :  { %164 = shalt.err (!%p161_p1)
}
 0x15b   :  { %s173_s10 = smov 64   ;;  %s174_s11 = smov 4  }
 0x15c   :  { %99 = dma.vmem_to_hbm [thread:$0]  %s94_s30, 128, %s232_s3, [#allocation4], %s173_s10, %s173_s10, %s174_s11  }
 0x15d   :  { %167 = dma.done.wait [#allocation4], 128  }
 0x15e   :  { %168 = vsyncadd [#allocation4], 4294967168 }
 0x15f   :  { %103 = vsyncpa [#allocation3], 1 }
 0x160   :  { %104 = vsyncpa [#allocation4], 1 }

</bundles_post_ra>
